<compile_context>
chip_gen: v7x
topology: tpu7x:2x2x1
jax: 0.10.0
libtpu: 0.0.40
codegen_flags: <defaults>
</compile_context>

<pallas_src>
import functools

import jax
import jax.numpy as jnp
from jax import lax
from jax.experimental import pallas as pl
from jax.experimental.pallas import tpu as pltpu


def _round_up(x, m):
    return (x + m - 1) // m * m


_K_SINGLE_BLOCK_MAX = 4096        # padded-K threshold for the no-K-axis path
_B_RESIDENT_BYTES_MAX = 16 << 20  # budget for a double-buffered resident weight column block
_VMEM_LIMIT_BYTES = 48 << 20      # v7x-safe (64 MiB physical), generous on v5e/v6e


# ---------------------------------------------------------------------------
# Pallas kernels.
# ---------------------------------------------------------------------------
def _mm_fused_kernel(a_ref, b_ref, shift_ref, o_ref, *, act):
    """Single-shot path: full K in one block.  out = act(a @ b + shift)."""
    y = jnp.dot(a_ref[...], b_ref[...], preferred_element_type=jnp.float32)
    y = y + shift_ref[...]
    if act == "relu":
        y = jnp.maximum(y, 0.0)
    elif act == "elu":
        y = jnp.where(y > 0, y, jnp.expm1(y))
    o_ref[...] = y.astype(o_ref.dtype)


def _mm_fused_acc_kernel(a_ref, b_ref, shift_ref, o_ref, acc_ref, *,
                         act, tk, b_resident):
    """K-tiled path with f32 VMEM accumulator; B is VMEM-resident across K
    (sliced with pl.ds) unless it is too large, in which case it is tiled."""
    k = pl.program_id(2)

    @pl.when(k == 0)
    def _():
        acc_ref[...] = jnp.zeros_like(acc_ref)

    if b_resident:
        off = pl.multiple_of(k * tk, tk)
        b_blk = b_ref[pl.ds(off, tk), :]
    else:
        b_blk = b_ref[...]

    acc_ref[...] += jnp.dot(a_ref[...], b_blk, preferred_element_type=jnp.float32)

    @pl.when(k == pl.num_programs(2) - 1)
    def _():
        y = acc_ref[...] + shift_ref[...]
        if act == "relu":
            y = jnp.maximum(y, 0.0)
        elif act == "elu":
            y = jnp.where(y > 0, y, jnp.expm1(y))
        o_ref[...] = y.astype(o_ref.dtype)


# ---------------------------------------------------------------------------
# Tiled matmul wrapper: out = act(a @ b + shift).
# ---------------------------------------------------------------------------
def _matmul_shift_act(a, b, shift, act, out_dtype):
    M, K = a.shape
    K2, N = b.shape
    assert K == K2

    # M tile: as large as the VMEM budget allows (amortizes per-grid-step cost).
    tm = min(_round_up(M, 8), 512)

    # N tile: cover the full padded Cout when it fits a single tile so the huge
    # im2col operand A is read from HBM exactly once; otherwise prefer 512/256
    # (multiples of the 256-wide v6e/v7x MXU).
    n128 = _round_up(N, 128)
    if n128 <= 512:
        tn = n128
    elif n128 % 512 == 0:
        tn = 512
    elif n128 % 256 == 0:
        tn = 256
    else:
        tn = 128

    single_k = _round_up(K, 128) <= _K_SINGLE_BLOCK_MAX
    tk = _round_up(K, 128) if single_k else 2048

    M_p, N_p, K_p = _round_up(M, tm), _round_up(N, tn), _round_up(K, tk)

    a_p = jnp.pad(a, ((0, M_p - M), (0, K_p - K)))
    b_p = jnp.pad(b, ((0, K_p - K), (0, N_p - N)))
    shift_p = jnp.pad(shift.reshape(1, N).astype(jnp.float32),
                      ((0, 0), (0, N_p - N)))

    if single_k:
        grid = (M_p // tm, N_p // tn)
        out_p = pl.pallas_call(
            functools.partial(_mm_fused_kernel, act=act),
            out_shape=jax.ShapeDtypeStruct((M_p, N_p), out_dtype),
            grid_spec=pltpu.PrefetchScalarGridSpec(
                num_scalar_prefetch=0,
                grid=grid,
                in_specs=[
                    pl.BlockSpec((tm, K_p), lambda i, j: (i, 0)),   # im2col patches
                    pl.BlockSpec((K_p, tn), lambda i, j: (0, j)),   # weight (K, Cout)
                    pl.BlockSpec((1, tn), lambda i, j: (0, j)),     # per-channel shift
                ],
                out_specs=pl.BlockSpec((tm, tn), lambda i, j: (i, j)),
            ),
            compiler_params=pltpu.CompilerParams(
                dimension_semantics=("parallel", "parallel"),
                vmem_limit_bytes=_VMEM_LIMIT_BYTES,
            ),
        )(a_p, b_p, shift_p)
    else:
        b_resident = (2 * K_p * tn * b_p.dtype.itemsize) <= _B_RESIDENT_BYTES_MAX
        if b_resident:
            # Full-K column block of the weight stays in VMEM across the K loop.
            b_spec = pl.BlockSpec((K_p, tn), lambda i, j, k: (0, j))
        else:
            b_spec = pl.BlockSpec((tk, tn), lambda i, j, k: (k, j))
        grid = (M_p // tm, N_p // tn, K_p // tk)
        out_p = pl.pallas_call(
            functools.partial(_mm_fused_acc_kernel, act=act, tk=tk,
                              b_resident=b_resident),
            out_shape=jax.ShapeDtypeStruct((M_p, N_p), out_dtype),
            grid_spec=pltpu.PrefetchScalarGridSpec(
                num_scalar_prefetch=0,
                grid=grid,
                in_specs=[
                    pl.BlockSpec((tm, tk), lambda i, j, k: (i, k)),
                    b_spec,
                    pl.BlockSpec((1, tn), lambda i, j, k: (0, j)),
                ],
                out_specs=pl.BlockSpec((tm, tn), lambda i, j, k: (i, j)),
                scratch_shapes=[pltpu.VMEM((tm, tn), jnp.float32)],
            ),
            compiler_params=pltpu.CompilerParams(
                dimension_semantics=("parallel", "parallel", "arbitrary"),
                vmem_limit_bytes=_VMEM_LIMIT_BYTES,
            ),
        )(a_p, b_p, shift_p)

    return out_p[:M, :N]


# ---------------------------------------------------------------------------
# im2col (pure layout plumbing, no conv op) + ConvBnRel forward wrapper.
# ---------------------------------------------------------------------------
def _im2col(x, kh, kw, stride, padding):
    """x: (N, C, H, W) -> (N*OH*OW, C*kh*kw) in PyTorch weight-flatten order."""
    n, c, h, w = x.shape
    if padding > 0:
        x = jnp.pad(x, ((0, 0), (0, 0), (padding, padding), (padding, padding)))
    hp, wp = x.shape[2], x.shape[3]
    oh = (hp - kh) // stride + 1
    ow = (wp - kw) // stride + 1
    cols = []
    for i in range(kh):
        for j in range(kw):
            cols.append(x[:, :, i:i + (oh - 1) * stride + 1:stride,
                             j:j + (ow - 1) * stride + 1:stride])  # (N, C, OH, OW)
    cols = jnp.stack(cols, axis=0)                 # (kh*kw, N, C, OH, OW)
    cols = cols.transpose(1, 3, 4, 2, 0)           # (N, OH, OW, C, kh*kw)
    return cols.reshape(n * oh * ow, c * kh * kw), oh, ow


def conv_bn_rel_forward(x, weight, *, stride=1, same_padding=False, bias=None,
                        bn_params=None, bn_eps=1e-4, active_unit="relu",
                        compute_dtype=jnp.bfloat16):
    """Forward of ConvBnRel (reverse=False): conv2d [+BN(inference)] [+ReLU/ELU]."""
    n, c_in, h, w = x.shape
    c_out, c_in2, kh, kw = weight.shape
    assert c_in == c_in2
    padding = (kh - 1) // 2 if same_padding else 0

    # Fold conv-bias and BatchNorm (running-stats form, eps=1e-4 as in the
    # module) into per-channel (scale, shift); scale is then folded into the
    # (small) weight so the kernel epilogue only needs shift + activation.
    scale = jnp.ones((c_out,), jnp.float32)
    shift = jnp.zeros((c_out,), jnp.float32)
    if bias is not None:
        shift = shift + bias.astype(jnp.float32)
    if bn_params is not None:
        gamma, beta, mean, var = bn_params
        inv = gamma.astype(jnp.float32) / jnp.sqrt(var.astype(jnp.float32) + bn_eps)
        scale = scale * inv
        shift = (shift - mean.astype(jnp.float32)) * inv + beta.astype(jnp.float32)

    # bf16 inputs for the MXU (f32 accumulation happens inside the kernel).
    a, oh, ow = _im2col(x.astype(compute_dtype), kh, kw, stride, padding)   # (M, K)
    b = (weight.reshape(c_out, c_in * kh * kw).astype(jnp.float32).T
         * scale[None, :]).astype(compute_dtype)                            # (K, Cout)

    out2d = _matmul_shift_act(a, b, shift, active_unit, x.dtype)
    return out2d.reshape(n, oh, ow, c_out).transpose(0, 3, 1, 2)  # (N, Cout, OH, OW)


# ---------------------------------------------------------------------------
# Reference (plain JAX) + self-test.
# ---------------------------------------------------------------------------
def _reference(x, weight, *, stride, same_padding, bias, bn_params, bn_eps, active_unit):
    kh = weight.shape[2]
    padding = (kh - 1) // 2 if same_padding else 0
    y = lax.conv_general_dilated(
        x, weight, window_strides=(stride, stride),
        padding=[(padding, padding), (padding, padding)],
        dimension_numbers=("NCHW", "OIHW", "NCHW"))
    if bias is not None:
        y = y + bias.reshape(1, -1, 1, 1)
    if bn_params is not None:
        gamma, beta, mean, var = bn_params
        y = (y - mean.reshape(1, -1, 1, 1)) / jnp.sqrt(var.reshape(1, -1, 1, 1) + bn_eps)
        y = y * gamma.reshape(1, -1, 1, 1) + beta.reshape(1, -1, 1, 1)
    if active_unit == "relu":
        y = jnp.maximum(y, 0.0)
    elif active_unit == "elu":
        y = jnp.where(y > 0, y, jnp.expm1(y))
    return y


if __name__ == "__main__":
    key = jax.random.PRNGKey(0)
    kx, kw, kg, kb, km, kv, kbias = jax.random.split(key, 7)

    batch, in_channels, out_channels, kernel_size, spatial = 2, 4, 8, 3, 16
    x = jax.random.normal(kx, (batch, in_channels, spatial, spatial), jnp.float32)
    weight = jax.random.normal(
        kw, (out_channels, in_channels, kernel_size, kernel_size), jnp.float32) * 0.1

    # bf16 MXU inputs + f32 accumulate -> relaxed tolerance vs the f32 reference.
    TOL = dict(atol=3e-2, rtol=3e-2)

    # Case 1: module defaults (bias=False, bn=False, relu, same_padding=False).
    out1 = conv_bn_rel_forward(x, weight, stride=1, same_padding=False,
                               bias=None, bn_params=None, active_unit="relu")
    out1 = jax.block_until_ready(out1)
    ref1 = _reference(x, weight, stride=1, same_padding=False, bias=None,
                      bn_params=None, bn_eps=1e-4, active_unit="relu")
    assert out1.shape == (batch, out_channels, spatial - 2, spatial - 2)
    assert jnp.allclose(out1, ref1, **TOL)

    # Case 2: bn=True (inference form), same_padding=True, relu.
    gamma = jax.random.uniform(kg, (out_channels,), jnp.float32, 0.5, 1.5)
    beta = jax.random.normal(kb, (out_channels,), jnp.float32) * 0.1
    mean = jax.random.normal(km, (out_channels,), jnp.float32) * 0.1
    var = jax.random.uniform(kv, (out_channels,), jnp.float32, 0.5, 1.5)
    bn_params = (gamma, beta, mean, var)

    out2 = conv_bn_rel_forward(x, weight, stride=1, same_padding=True,
                               bias=None, bn_params=bn_params, bn_eps=1e-4,
                               active_unit="relu")
    out2 = jax.block_until_ready(out2)
    ref2 = _reference(x, weight, stride=1, same_padding=True, bias=None,
                      bn_params=bn_params, bn_eps=1e-4, active_unit="relu")
    assert out2.shape == (batch, out_channels, spatial, spatial)
    assert jnp.allclose(out2, ref2, **TOL)

    # Case 3: bias=True, elu, same_padding=True.
    bias = jax.random.normal(kbias, (out_channels,), jnp.float32) * 0.1
    out3 = conv_bn_rel_forward(x, weight, stride=1, same_padding=True,
                               bias=bias, bn_params=None, active_unit="elu")
    out3 = jax.block_until_ready(out3)
    ref3 = _reference(x, weight, stride=1, same_padding=True, bias=bias,
                      bn_params=None, bn_eps=1e-4, active_unit="elu")
    assert out3.shape == (batch, out_channels, spatial, spatial)
    assert jnp.allclose(out3, ref3, **TOL)

    print("KERNEL_OK")
</pallas_src>

<mosaic_0001>
module attributes {stable_mosaic.version = 11 : i64} {
  func.func @_mm_fused_kernel(%arg0: i32, %arg1: i32, %arg2: memref<392x128xbf16, #tpu.memory_space<vmem>>, %arg3: memref<128x128xbf16, #tpu.memory_space<vmem>>, %arg4: memref<1x128xf32, #tpu.memory_space<vmem>>, %arg5: memref<392x128xf32, #tpu.memory_space<vmem>>) attributes {dimension_semantics = [#tpu.dimension_semantics<parallel>, #tpu.dimension_semantics<parallel>], iteration_bounds = array<i64: 1, 1>, scalar_prefetch = 0 : i64, scratch_operands = 0 : i64, tpu.core_type = #tpu.core_type<tc>, window_params = [{transform_indices = @transform_0, window_bounds = array<i64: 392, 128>}, {transform_indices = @transform_1, window_bounds = array<i64: 128, 128>}, {transform_indices = @transform_2, window_bounds = array<i64: 1, 128>}, {transform_indices = @transform_3, window_bounds = array<i64: 392, 128>}]} {
    %c0 = arith.constant 0 : index
    %c0_0 = arith.constant 0 : index
    %0 = vector.load %arg2[%c0, %c0_0] : memref<392x128xbf16, #tpu.memory_space<vmem>>, vector<392x128xbf16>
    %c0_1 = arith.constant 0 : index
    %c0_2 = arith.constant 0 : index
    %1 = vector.load %arg3[%c0_1, %c0_2] : memref<128x128xbf16, #tpu.memory_space<vmem>>, vector<128x128xbf16>
    %cst = arith.constant dense<0.000000e+00> : vector<392x128xf32>
    %2 = tpu.matmul %0, %1, %cst {dimension_numbers = #tpu.dot_dimension_numbers<[1], [0], [0], [1], [0, 0, 1, 1], [], []>} : vector<392x128xbf16>, vector<128x128xbf16>, vector<392x128xf32> -> vector<392x128xf32>
    %c0_3 = arith.constant 0 : index
    %c0_4 = arith.constant 0 : index
    %3 = vector.load %arg4[%c0_3, %c0_4] : memref<1x128xf32, #tpu.memory_space<vmem>>, vector<1x128xf32>
    %4 = vector.broadcast %3 : vector<1x128xf32> to vector<392x128xf32>
    %5 = arith.addf %2, %4 : vector<392x128xf32>
    %cst_5 = arith.constant 0.000000e+00 : f32
    %6 = vector.broadcast %cst_5 : f32 to vector<392x128xf32>
    %7 = arith.maximumf %5, %6 : vector<392x128xf32>
    %c0_6 = arith.constant 0 : index
    %c0_7 = arith.constant 0 : index
    %8 = vector.load %arg5[%c0_6, %c0_7] : memref<392x128xf32, #tpu.memory_space<vmem>>, vector<392x128xf32>
    tpu.vector_store %arg5[%c0_6, %c0_7], %7 {strides = array<i32>} : memref<392x128xf32, #tpu.memory_space<vmem>>, vector<392x128xf32>,
    return
  }
  func.func @transform_0(%arg0: i32, %arg1: i32) -> (i32, i32) {
    %c0_i32 = arith.constant 0 : i32
    %c0_i32_0 = arith.constant 0 : i32
    return %arg0, %c0_i32 : i32, i32
  }
  func.func @transform_1(%arg0: i32, %arg1: i32) -> (i32, i32) {
    %c0_i32 = arith.constant 0 : i32
    %c0_i32_0 = arith.constant 0 : i32
    return %c0_i32, %arg1 : i32, i32
  }
  func.func @transform_2(%arg0: i32, %arg1: i32) -> (i32, i32) {
    %c0_i32 = arith.constant 0 : i32
    %c0_i32_0 = arith.constant 0 : i32
    return %c0_i32, %arg1 : i32, i32
  }
  func.func @transform_3(%arg0: i32, %arg1: i32) -> (i32, i32) {
    %c0_i32 = arith.constant 0 : i32
    return %arg0, %arg1 : i32, i32
  }
}

</mosaic_0001>

<bundles_post_ra>
// kernel: tpu_custom_call.1
= control target key start
LH: loop header
LB: loop body
LE: loop exit
PB: predicated region body
PF: predicated region fallthrough
CT: control target
= control target key end

     0   :  { %8 = vsyncpa [#allocation3], 0  ;;  %s1158_s0 = inlined_call_operand.hbm [shape: bf16[392,128], index: 0, kind: input, shape index: {}]   ;;  %s1159_s1 = inlined_call_operand.hbm [shape: bf16[128,128], index: 1, kind: input, shape index: {}]   ;;  %s1160_s2 = inlined_call_operand.vmem [shape: f32[1,128], index: 2, kind: input, shape index: {}]   ;;  %s1161_s3 = inlined_call_operand.hbm [shape: f32[392,128], index: 3, kind: output, shape index: {}]  }
   0x1   :  { %9 = vsyncpa [#allocation6], 0 }
   0x2   :  { %10 = vsyncpa [#allocation4], 0  ;;  %s973_s12 = smov [#allocation2]   ;;  %s901_s16 = scalar_lea.hbm %s1158_s0, 3136 }
   0x3   :  { %s16_s13 = sshll.u32 %s973_s12, 4  ;;  %p902_p0 = scmp.ne.s32.totalorder %s1158_s0, %s901_s16  ;;  %s17_s13 = int_to_ptr.vmem [resolvable:$true] %s16_s13 }
   0x4   :  { %p905_p1 = scmp.lt.u32.totalorder %s901_s16, %s1158_s0 }
   0x6   :  { %p907_p2 = pnand %p905_p1, %p902_p0 }
   0x8   :  { %910 = shalt.err (!%p907_p2)
}
   0x9   :  { %s911_s21 = scalar_lea.vmem %s17_s13, 3136  ;;  %p916_p4 = scmp.lt.s32.totalorder %s17_s13, %s17_s13 }
   0xa   :  { %p912_p3 = scmp.ne.s32.totalorder %s17_s13, %s911_s21  ;;  %p917_p5 = scmp.lt.s32.totalorder %s911_s21, %s911_s21 }
   0xc   :  { %p918_p6 = por %p917_p5, %p916_p4 }
   0xe   :  { %p919_p7 = pnand %p918_p6, %p912_p3 }
  0x10   :  { %922 = shalt.err (!%p919_p7)
}
  0x11   :  { %s974_s22 = smov 64   ;;  %s975_s23 = smov 4  }
  0x12   :  { %22 = dma.hbm_to_vmem [thread:$0]  %s1158_s0, 3136, %s17_s13, [#allocation3], %s974_s22, %s974_s22, %s975_s23  }
  0x13   :  { %s976_s26 = smov [#allocation5]   ;;  %s923_s30 = scalar_lea.hbm %s1159_s1, 1024 }
  0x14   :  { %s28_s27 = sshll.u32 %s976_s26, 4  ;;  %p924_p8 = scmp.ne.s32.totalorder %s1159_s1, %s923_s30  ;;  %s29_s27 = int_to_ptr.vmem [resolvable:$true] %s28_s27 }
  0x15   :  { %p927_p9 = scmp.lt.u32.totalorder %s923_s30, %s1159_s1 }
  0x17   :  { %p929_p10 = pnand %p927_p9, %p924_p8 }
  0x19   :  { %932 = shalt.err (!%p929_p10)
}
  0x1a   :  { %s933_s8 = scalar_lea.vmem %s29_s27, 1024  ;;  %p938_p12 = scmp.lt.s32.totalorder %s29_s27, %s29_s27 }
  0x1b   :  { %p934_p11 = scmp.ne.s32.totalorder %s29_s27, %s933_s8  ;;  %p939_p13 = scmp.lt.s32.totalorder %s933_s8, %s933_s8 }
  0x1d   :  { %p940_p0 = por %p939_p13, %p938_p12 }
  0x1f   :  { %p941_p1 = pnand %p940_p0, %p934_p11 }
  0x21   :  { %944 = shalt.err (!%p941_p1)
}
  0x22   :  { %34 = dma.hbm_to_vmem [thread:$0]  %s1159_s1, 1024, %s29_s27, [#allocation6], %s974_s22, %s974_s22, %s975_s23  }
  0x23   :  { %967 = dma.done.wait [#allocation3], 3136  }
  0x24   :  { %968 = vsyncadd [#allocation3], 4294964160 }
  0x25   :  { %969 = dma.done.wait [#allocation6], 1024  }
  0x26   :  { %970 = vsyncadd [#allocation6], 4294966272  ;;  %v977_v0 = vmov 0.0   ;;  %vm978_vm0 = vmmov 0   ;;  %v868_v1 = vld [vmem:[#allocation5] sm:$0xff]   ;;  %v869_v2 = vld [vmem:[#allocation5 + $0x8] sm:$0xff]  }
  0x27   :  { %727 = vmatprep.subr.bf16.mxu0 %v977_v0  ;;  %843 = vmatprep.subr.bf16.mxu1 %v977_v0  ;;  %v870_v3 = vld [vmem:[#allocation5 + $0x10] sm:$0xff]   ;;  %v871_v4 = vld [vmem:[#allocation5 + $0x18] sm:$0xff]   ;;  %v872_v5 = vld [vmem:[#allocation5 + $0x20] sm:$0xff]  }
  0x28   :  { %743 = vmatprep.mubr.msk.bf16.mxu0 %vm978_vm0, %v977_v0  ;;  %795 = vmatprep.mubr.msk.bf16.mxu1 %vm978_vm0, %v977_v0  ;;  %v873_v6 = vld [vmem:[#allocation5 + $0x28] sm:$0xff]   ;;  %v874_v7 = vld [vmem:[#allocation5 + $0x30] sm:$0xff]   ;;  %v875_v8 = vld [vmem:[#allocation5 + $0x38] sm:$0xff]  }
  0x29   :  { %728 = vmatpush3.bf16.msra.mxu0 %v868_v1  ;;  %851 = vmatpush3.bf16.msra.mxu1 %v868_v1  ;;  %v876_v9 = vld [vmem:[#allocation2] sm:$0xff]   ;;  %v877_v10 = vld [vmem:[#allocation2 + $0x68] sm:$0xff]   ;;  %v879_v12 = vld [vmem:[#allocation2 + $0x70] sm:$0xff]  }
  0x2a   :  { %729 = vmatprep.subr.bf16.mxu0 %v977_v0  ;;  %844 = vmatprep.subr.bf16.mxu1 %v977_v0  ;;  %v878_v11 = vld [vmem:[#allocation2 + $0x8] sm:$0xff]   ;;  %v880_v13 = vld [vmem:[#allocation2 + $0x10] sm:$0xff]   ;;  %v881_v14 = vld [vmem:[#allocation2 + $0x78] sm:$0xff]  }
  0x2b   :  { %v882_v15 = vld [vmem:[#allocation2 + $0x18] sm:$0xff]   ;;  %v883_v16 = vld [vmem:[#allocation2 + $0x80] sm:$0xff]   ;;  %v885_v18 = vld [vmem:[#allocation2 + $0x88] sm:$0xff]  }
  0x2c   :  { %v884_v17 = vld [vmem:[#allocation2 + $0x20] sm:$0xff]   ;;  %v886_v19 = vld [vmem:[#allocation2 + $0x28] sm:$0xff]   ;;  %v887_v20 = vld [vmem:[#allocation2 + $0x90] sm:$0xff]  }
  0x2d   :  { %730 = vmatpush3.bf16.msra.mxu0 %v869_v2  ;;  %852 = vmatpush3.bf16.msra.mxu1 %v869_v2  ;;  %v888_v21 = vld [vmem:[#allocation2 + $0x30] sm:$0xff]   ;;  %v889_v22 = vld [vmem:[#allocation2 + $0x98] sm:$0xff]   ;;  %v891_v24 = vld [vmem:[#allocation2 + $0xa0] sm:$0xff]  }
  0x2e   :  { %731 = vmatprep.subr.bf16.mxu0 %v977_v0  ;;  %845 = vmatprep.subr.bf16.mxu1 %v977_v0  ;;  %v890_v23 = vld [vmem:[#allocation2 + $0x38] sm:$0xff]   ;;  %v892_v25 = vld [vmem:[#allocation2 + $0x40] sm:$0xff]   ;;  %v893_v26 = vld [vmem:[#allocation2 + $0xa8] sm:$0xff]  }
  0x2f   :  { %v894_v27 = vld [vmem:[#allocation2 + $0x48] sm:$0xff]   ;;  %v895_v28 = vld [vmem:[#allocation2 + $0xb0] sm:$0xff]   ;;  %v897_v30 = vld [vmem:[#allocation2 + $0xb8] sm:$0xff]  }
  0x30   :  { %v896_v29 = vld [vmem:[#allocation2 + $0x50] sm:$0xff]   ;;  %v898_v31 = vld [vmem:[#allocation2 + $0x58] sm:$0xff]   ;;  %v899_v32 = vld [vmem:[#allocation2 + $0xc0] ss:$0 sps:$4 sm:$0xff]  }
  0x31   :  { %732 = vmatpush3.bf16.msra.mxu0 %v870_v3  ;;  %853 = vmatpush3.bf16.msra.mxu1 %v870_v3  ;;  %v900_v33 = vld [vmem:[#allocation2 + $0x60] sm:$0xff]  }
  0x32   :  { %733 = vmatprep.subr.bf16.mxu0 %v977_v0  ;;  %846 = vmatprep.subr.bf16.mxu1 %v977_v0  ;;  %v1095_v34 = vld [vmem:[%s1160_s2] ss:$0 sm:$0xff]  ;;  %s979_s2 = smov [#allocation7]  }
  0x33   :  { %s647_s11 = sshll.u32 %s979_s2, 4  ;;  %s648_s11 = int_to_ptr.vmem [resolvable:$true] %s647_s11 }
  0x34   :  { %s945_s12 = scalar_lea.vmem %s648_s11, 6272  ;;  %p950_p3 = scmp.lt.s32.totalorder %s648_s11, %s648_s11 }
  0x35   :  { %734 = vmatpush3.bf16.msra.mxu0 %v871_v4  ;;  %854 = vmatpush3.bf16.msra.mxu1 %v871_v4  ;;  %p946_p2 = scmp.ne.s32.totalorder %s648_s11, %s945_s12  ;;  %p951_p4 = scmp.lt.s32.totalorder %s945_s12, %s945_s12 }
  0x36   :  { %735 = vmatprep.subr.bf16.mxu0 %v977_v0  ;;  %847 = vmatprep.subr.bf16.mxu1 %v977_v0 }
  0x37   :  { %p952_p5 = por %p951_p4, %p950_p3 }
  0x39   :  { %736 = vmatpush3.bf16.msra.mxu0 %v872_v5  ;;  %855 = vmatpush3.bf16.msra.mxu1 %v872_v5  ;;  %p953_p6 = pnand %p952_p5, %p946_p2 }
  0x3a   :  { %737 = vmatprep.subr.bf16.mxu0 %v977_v0  ;;  %848 = vmatprep.subr.bf16.mxu1 %v977_v0 }
  0x3d   :  { %738 = vmatpush3.bf16.msra.mxu0 %v873_v6  ;;  %856 = vmatpush3.bf16.msra.mxu1 %v873_v6 }
  0x3e   :  { %739 = vmatprep.subr.bf16.mxu0 %v977_v0  ;;  %849 = vmatprep.subr.bf16.mxu1 %v977_v0 }
  0x41   :  { %740 = vmatpush3.bf16.msra.mxu0 %v874_v7  ;;  %857 = vmatpush3.bf16.msra.mxu1 %v874_v7 }
  0x42   :  { %741 = vmatprep.subr.bf16.mxu0 %v977_v0  ;;  %850 = vmatprep.subr.bf16.mxu1 %v977_v0 }
  0x45   :  { %742 = vmatpush3.bf16.msra.mxu0 %v875_v8  ;;  %858 = vmatpush3.bf16.msra.mxu1 %v875_v8 }
  0x48   :  { %744 = vmatmul.mubr.bf16.vlgmr.msra.gmra.mrb[0].mxu0 %v876_v9  ;;  %796 = vmatmul.mubr.bf16.vlgmr.msra.gmra.mrb[0].mxu1 %v877_v10 }
  0x49   :  { %747 = vmatprep.mubr.msk.bf16.mxu0 %vm978_vm0, %v977_v0  ;;  %799 = vmatprep.mubr.msk.bf16.mxu1 %vm978_vm0, %v977_v0 }
  0x50   :  { %748 = vmatmul.mubr.bf16.gmra.mrb[4].mxu0 %v878_v11  ;;  %800 = vmatmul.mubr.bf16.gmra.mrb[4].mxu1 %v879_v12 }
  0x51   :  { %751 = vmatprep.mubr.msk.bf16.mxu0 %vm978_vm0, %v977_v0  ;;  %803 = vmatprep.mubr.msk.bf16.mxu1 %vm978_vm0, %v977_v0 }
  0x58   :  { %752 = vmatmul.mubr.bf16.gmra.mrb[8].mxu0 %v880_v13  ;;  %804 = vmatmul.mubr.bf16.gmra.mrb[8].mxu1 %v881_v14 }
  0x59   :  { %755 = vmatprep.mubr.msk.bf16.mxu0 %vm978_vm0, %v977_v0  ;;  %807 = vmatprep.mubr.msk.bf16.mxu1 %vm978_vm0, %v977_v0 }
  0x60   :  { %756 = vmatmul.mubr.bf16.gmra.mrb[12].mxu0 %v882_v15  ;;  %808 = vmatmul.mubr.bf16.gmra.mrb[12].mxu1 %v883_v16 }
  0x61   :  { %759 = vmatprep.mubr.msk.bf16.mxu0 %vm978_vm0, %v977_v0  ;;  %811 = vmatprep.mubr.msk.bf16.mxu1 %vm978_vm0, %v977_v0 }
  0x68   :  { %760 = vmatmul.mubr.bf16.gmra.mrb[16].mxu0 %v884_v17  ;;  %812 = vmatmul.mubr.bf16.gmra.mrb[16].mxu1 %v885_v18 }
  0x69   :  { %763 = vmatprep.mubr.msk.bf16.mxu0 %vm978_vm0, %v977_v0  ;;  %815 = vmatprep.mubr.msk.bf16.mxu1 %vm978_vm0, %v977_v0 }
  0x70   :  { %764 = vmatmul.mubr.bf16.gmra.mrb[20].mxu0 %v886_v19  ;;  %816 = vmatmul.mubr.bf16.gmra.mrb[20].mxu1 %v887_v20 }
  0x71   :  { %767 = vmatprep.mubr.msk.bf16.mxu0 %vm978_vm0, %v977_v0  ;;  %819 = vmatprep.mubr.msk.bf16.mxu1 %vm978_vm0, %v977_v0 }
  0x78   :  { %768 = vmatmul.mubr.bf16.gmra.mrb[24].mxu0 %v888_v21  ;;  %820 = vmatmul.mubr.bf16.gmra.mrb[24].mxu1 %v889_v22 }
  0x79   :  { %771 = vmatprep.mubr.msk.bf16.mxu0 %vm978_vm0, %v977_v0  ;;  %823 = vmatprep.mubr.msk.bf16.mxu1 %vm978_vm0, %v977_v0 }
  0x80   :  { %772 = vmatmul.mubr.bf16.gmra.mrb[28].mxu0 %v890_v23  ;;  %824 = vmatmul.mubr.bf16.gmra.mrb[28].mxu1 %v891_v24 }
  0x81   :  { %775 = vmatprep.mubr.msk.bf16.mxu0 %vm978_vm0, %v977_v0  ;;  %827 = vmatprep.mubr.msk.bf16.mxu1 %vm978_vm0, %v977_v0 }
  0x88   :  { %776 = vmatmul.mubr.bf16.gmra.mrb[32].mxu0 %v892_v25  ;;  %828 = vmatmul.mubr.bf16.gmra.mrb[32].mxu1 %v893_v26 }
  0x89   :  { %779 = vmatprep.mubr.msk.bf16.mxu0 %vm978_vm0, %v977_v0  ;;  %831 = vmatprep.mubr.msk.bf16.mxu1 %vm978_vm0, %v977_v0 }
  0x90   :  { %780 = vmatmul.mubr.bf16.gmra.mrb[36].mxu0 %v894_v27  ;;  %832 = vmatmul.mubr.bf16.gmra.mrb[36].mxu1 %v895_v28 }
  0x91   :  { %783 = vmatprep.mubr.msk.bf16.mxu0 %vm978_vm0, %v977_v0  ;;  %835 = vmatprep.mubr.msk.bf16.mxu1 %vm978_vm0, %v977_v0 }
  0x98   :  { %784 = vmatmul.mubr.bf16.gmra.mrb[40].mxu0 %v896_v29  ;;  %836 = vmatmul.mubr.bf16.gmra.mrb[40].mxu1 %v897_v30 }
  0x99   :  { %787 = vmatprep.mubr.msk.bf16.mxu0 %vm978_vm0, %v977_v0  ;;  %839 = vmatprep.mubr.msk.bf16.mxu1 %vm978_vm0, %v977_v0 }
  0xa0   :  { %788 = vmatmul.mubr.bf16.gmra.mrb[44].mxu0 %v898_v31  ;;  %840 = vmatmul.mubr.bf16.gmra.mrb[44].mxu1 %v899_v32 }
  0xa1   :  { %791 = vmatprep.mubr.msk.bf16.mxu0 %vm978_vm0, %v977_v0 }
  0xa8   :  { %792 = vmatmul.mubr.bf16.gmra.mrb[48].mxu0 %v900_v33 }
 0x11b   :  { %v346_v35 = vpop.f32.mrb[0].mxu0  ;;  %v450_v36 = vpop.f32.mrb[0].mxu1 }
 0x11c   :  { %v347_v37 = vadd.f32 %v1095_v34, %v346_v35  ;;  %v745_v38 = vpop.f32.mrb[1].mxu0  ;;  %v451_v39 = vadd.f32 %v1095_v34, %v450_v36  ;;  %v797_v40 = vpop.f32.mrb[1].mxu1 }
 0x11d   :  { %v349_v41 = vpop.f32.mrb[2].mxu0  ;;  %v453_v42 = vpop.f32.mrb[2].mxu1 }
 0x11e   :  { %v544_v43 = vmax.f32 %v347_v37, 0.0  ;;  %v350_v44 = vadd.f32 %v1095_v34, %v349_v41  ;;  %v746_v45 = vpop.f32.mrb[3].mxu0  ;;  %v570_v46 = vmax.f32 %v451_v39, 0.0  ;;  %v454_v47 = vadd.f32 %v1095_v34, %v453_v42  ;;  %v798_v48 = vpop.f32.mrb[3].mxu1 }
 0x120   :  { %593 = vst [vmem:[#allocation7] sm:$0xff] %v544_v43  ;;  %v545_v49 = vmax.f32 %v350_v44, 0.0  ;;  %619 = vst [vmem:[#allocation7 + $0xd0] sm:$0xff] %v570_v46  ;;  %v571_v50 = vmax.f32 %v454_v47, 0.0 }
 0x122   :  { %594 = vst [vmem:[#allocation7 + $0x8] sm:$0xff] %v545_v49  ;;  %620 = vst [vmem:[#allocation7 + $0xd8] sm:$0xff] %v571_v50 }
 0x123   :  { %v354_v51 = vpop.f32.mrb[4].mxu0  ;;  %v458_v52 = vpop.f32.mrb[4].mxu1 }
 0x124   :  { %v355_v53 = vadd.f32 %v1095_v34, %v354_v51  ;;  %v749_v54 = vpop.f32.mrb[5].mxu0  ;;  %v459_v55 = vadd.f32 %v1095_v34, %v458_v52  ;;  %v801_v56 = vpop.f32.mrb[5].mxu1 }
 0x125   :  { %v357_v57 = vpop.f32.mrb[6].mxu0  ;;  %v461_v58 = vpop.f32.mrb[6].mxu1 }
 0x126   :  { %v546_v59 = vmax.f32 %v355_v53, 0.0  ;;  %v358_v60 = vadd.f32 %v1095_v34, %v357_v57  ;;  %v750_v61 = vpop.f32.mrb[7].mxu0  ;;  %v572_v62 = vmax.f32 %v459_v55, 0.0  ;;  %v462_v63 = vadd.f32 %v1095_v34, %v461_v58  ;;  %v802_v0 = vpop.f32.mrb[7].mxu1 }
 0x128   :  { %595 = vst [vmem:[#allocation7 + $0x10] sm:$0xff] %v546_v59  ;;  %v547_v1 = vmax.f32 %v358_v60, 0.0  ;;  %621 = vst [vmem:[#allocation7 + $0xe0] sm:$0xff] %v572_v62  ;;  %v573_v2 = vmax.f32 %v462_v63, 0.0 }
 0x12a   :  { %596 = vst [vmem:[#allocation7 + $0x18] sm:$0xff] %v547_v1  ;;  %622 = vst [vmem:[#allocation7 + $0xe8] sm:$0xff] %v573_v2 }
 0x12b   :  { %v362_v3 = vpop.f32.mrb[8].mxu0  ;;  %v466_v4 = vpop.f32.mrb[8].mxu1 }
 0x12c   :  { %v363_v5 = vadd.f32 %v1095_v34, %v362_v3  ;;  %v753_v6 = vpop.f32.mrb[9].mxu0  ;;  %v467_v7 = vadd.f32 %v1095_v34, %v466_v4  ;;  %v805_v8 = vpop.f32.mrb[9].mxu1 }
 0x12d   :  { %v365_v9 = vpop.f32.mrb[10].mxu0  ;;  %v469_v10 = vpop.f32.mrb[10].mxu1 }
 0x12e   :  { %v548_v11 = vmax.f32 %v363_v5, 0.0  ;;  %v366_v12 = vadd.f32 %v1095_v34, %v365_v9  ;;  %v754_v13 = vpop.f32.mrb[11].mxu0  ;;  %v574_v14 = vmax.f32 %v467_v7, 0.0  ;;  %v470_v15 = vadd.f32 %v1095_v34, %v469_v10  ;;  %v806_v16 = vpop.f32.mrb[11].mxu1 }
 0x130   :  { %597 = vst [vmem:[#allocation7 + $0x20] sm:$0xff] %v548_v11  ;;  %v549_v17 = vmax.f32 %v366_v12, 0.0  ;;  %623 = vst [vmem:[#allocation7 + $0xf0] sm:$0xff] %v574_v14  ;;  %v575_v18 = vmax.f32 %v470_v15, 0.0 }
 0x132   :  { %598 = vst [vmem:[#allocation7 + $0x28] sm:$0xff] %v549_v17  ;;  %624 = vst [vmem:[#allocation7 + $0xf8] sm:$0xff] %v575_v18 }
 0x133   :  { %v370_v19 = vpop.f32.mrb[12].mxu0  ;;  %v474_v20 = vpop.f32.mrb[12].mxu1 }
 0x134   :  { %v371_v21 = vadd.f32 %v1095_v34, %v370_v19  ;;  %v757_v22 = vpop.f32.mrb[13].mxu0  ;;  %v475_v23 = vadd.f32 %v1095_v34, %v474_v20  ;;  %v809_v24 = vpop.f32.mrb[13].mxu1 }
 0x135   :  { %v373_v25 = vpop.f32.mrb[14].mxu0  ;;  %v477_v26 = vpop.f32.mrb[14].mxu1 }
 0x136   :  { %v550_v27 = vmax.f32 %v371_v21, 0.0  ;;  %v374_v28 = vadd.f32 %v1095_v34, %v373_v25  ;;  %v758_v29 = vpop.f32.mrb[15].mxu0  ;;  %v576_v30 = vmax.f32 %v475_v23, 0.0  ;;  %v478_v31 = vadd.f32 %v1095_v34, %v477_v26  ;;  %v810_v32 = vpop.f32.mrb[15].mxu1 }
 0x138   :  { %599 = vst [vmem:[#allocation7 + $0x30] sm:$0xff] %v550_v27  ;;  %v551_v33 = vmax.f32 %v374_v28, 0.0  ;;  %625 = vst [vmem:[#allocation7 + $0x100] sm:$0xff] %v576_v30  ;;  %v577_v35 = vmax.f32 %v478_v31, 0.0 }
 0x13a   :  { %600 = vst [vmem:[#allocation7 + $0x38] sm:$0xff] %v551_v33  ;;  %626 = vst [vmem:[#allocation7 + $0x108] sm:$0xff] %v577_v35 }
 0x13b   :  { %v378_v36 = vpop.f32.mrb[16].mxu0  ;;  %v482_v37 = vpop.f32.mrb[16].mxu1 }
 0x13c   :  { %v379_v38 = vadd.f32 %v1095_v34, %v378_v36  ;;  %v761_v39 = vpop.f32.mrb[17].mxu0  ;;  %v483_v40 = vadd.f32 %v1095_v34, %v482_v37  ;;  %v813_v41 = vpop.f32.mrb[17].mxu1 }
 0x13d   :  { %v381_v42 = vpop.f32.mrb[18].mxu0  ;;  %v485_v43 = vpop.f32.mrb[18].mxu1 }
 0x13e   :  { %v552_v44 = vmax.f32 %v379_v38, 0.0  ;;  %v382_v45 = vadd.f32 %v1095_v34, %v381_v42  ;;  %v762_v46 = vpop.f32.mrb[19].mxu0  ;;  %v578_v47 = vmax.f32 %v483_v40, 0.0  ;;  %v486_v48 = vadd.f32 %v1095_v34, %v485_v43  ;;  %v814_v49 = vpop.f32.mrb[19].mxu1 }
 0x140   :  { %601 = vst [vmem:[#allocation7 + $0x40] sm:$0xff] %v552_v44  ;;  %v553_v50 = vmax.f32 %v382_v45, 0.0  ;;  %627 = vst [vmem:[#allocation7 + $0x110] sm:$0xff] %v578_v47  ;;  %v579_v51 = vmax.f32 %v486_v48, 0.0 }
 0x142   :  { %602 = vst [vmem:[#allocation7 + $0x48] sm:$0xff] %v553_v50  ;;  %628 = vst [vmem:[#allocation7 + $0x118] sm:$0xff] %v579_v51 }
 0x143   :  { %v386_v52 = vpop.f32.mrb[20].mxu0  ;;  %v490_v53 = vpop.f32.mrb[20].mxu1 }
 0x144   :  { %v387_v54 = vadd.f32 %v1095_v34, %v386_v52  ;;  %v765_v55 = vpop.f32.mrb[21].mxu0  ;;  %v491_v56 = vadd.f32 %v1095_v34, %v490_v53  ;;  %v817_v57 = vpop.f32.mrb[21].mxu1 }
 0x145   :  { %v389_v58 = vpop.f32.mrb[22].mxu0  ;;  %v493_v59 = vpop.f32.mrb[22].mxu1 }
 0x146   :  { %v554_v60 = vmax.f32 %v387_v54, 0.0  ;;  %v390_v61 = vadd.f32 %v1095_v34, %v389_v58  ;;  %v766_v62 = vpop.f32.mrb[23].mxu0  ;;  %v580_v63 = vmax.f32 %v491_v56, 0.0  ;;  %v494_v0 = vadd.f32 %v1095_v34, %v493_v59  ;;  %v818_v1 = vpop.f32.mrb[23].mxu1 }
 0x148   :  { %603 = vst [vmem:[#allocation7 + $0x50] sm:$0xff] %v554_v60  ;;  %v555_v2 = vmax.f32 %v390_v61, 0.0  ;;  %629 = vst [vmem:[#allocation7 + $0x120] sm:$0xff] %v580_v63  ;;  %v581_v3 = vmax.f32 %v494_v0, 0.0 }
 0x14a   :  { %604 = vst [vmem:[#allocation7 + $0x58] sm:$0xff] %v555_v2  ;;  %630 = vst [vmem:[#allocation7 + $0x128] sm:$0xff] %v581_v3 }
 0x14b   :  { %v394_v4 = vpop.f32.mrb[24].mxu0  ;;  %v498_v5 = vpop.f32.mrb[24].mxu1 }
 0x14c   :  { %v395_v6 = vadd.f32 %v1095_v34, %v394_v4  ;;  %v769_v7 = vpop.f32.mrb[25].mxu0  ;;  %v499_v8 = vadd.f32 %v1095_v34, %v498_v5  ;;  %v821_v9 = vpop.f32.mrb[25].mxu1 }
 0x14d   :  { %v397_v10 = vpop.f32.mrb[26].mxu0  ;;  %v501_v11 = vpop.f32.mrb[26].mxu1 }
 0x14e   :  { %v556_v12 = vmax.f32 %v395_v6, 0.0  ;;  %v398_v13 = vadd.f32 %v1095_v34, %v397_v10  ;;  %v770_v14 = vpop.f32.mrb[27].mxu0  ;;  %v582_v15 = vmax.f32 %v499_v8, 0.0  ;;  %v502_v16 = vadd.f32 %v1095_v34, %v501_v11  ;;  %v822_v17 = vpop.f32.mrb[27].mxu1 }
 0x150   :  { %605 = vst [vmem:[#allocation7 + $0x60] sm:$0xff] %v556_v12  ;;  %v557_v18 = vmax.f32 %v398_v13, 0.0  ;;  %631 = vst [vmem:[#allocation7 + $0x130] sm:$0xff] %v582_v15  ;;  %v583_v19 = vmax.f32 %v502_v16, 0.0 }
 0x152   :  { %606 = vst [vmem:[#allocation7 + $0x68] sm:$0xff] %v557_v18  ;;  %632 = vst [vmem:[#allocation7 + $0x138] sm:$0xff] %v583_v19 }
 0x153   :  { %v402_v20 = vpop.f32.mrb[28].mxu0  ;;  %v506_v21 = vpop.f32.mrb[28].mxu1 }
 0x154   :  { %v403_v22 = vadd.f32 %v1095_v34, %v402_v20  ;;  %v773_v23 = vpop.f32.mrb[29].mxu0  ;;  %v507_v24 = vadd.f32 %v1095_v34, %v506_v21  ;;  %v825_v25 = vpop.f32.mrb[29].mxu1 }
 0x155   :  { %v405_v26 = vpop.f32.mrb[30].mxu0  ;;  %v509_v27 = vpop.f32.mrb[30].mxu1 }
 0x156   :  { %v558_v28 = vmax.f32 %v403_v22, 0.0  ;;  %v406_v29 = vadd.f32 %v1095_v34, %v405_v26  ;;  %v774_v30 = vpop.f32.mrb[31].mxu0  ;;  %v584_v31 = vmax.f32 %v507_v24, 0.0  ;;  %v510_v32 = vadd.f32 %v1095_v34, %v509_v27  ;;  %v826_v33 = vpop.f32.mrb[31].mxu1 }
 0x158   :  { %607 = vst [vmem:[#allocation7 + $0x70] sm:$0xff] %v558_v28  ;;  %v559_v35 = vmax.f32 %v406_v29, 0.0  ;;  %633 = vst [vmem:[#allocation7 + $0x140] sm:$0xff] %v584_v31  ;;  %v585_v36 = vmax.f32 %v510_v32, 0.0 }
 0x15a   :  { %608 = vst [vmem:[#allocation7 + $0x78] sm:$0xff] %v559_v35  ;;  %634 = vst [vmem:[#allocation7 + $0x148] sm:$0xff] %v585_v36 }
 0x15b   :  { %v410_v37 = vpop.f32.mrb[32].mxu0  ;;  %v514_v38 = vpop.f32.mrb[32].mxu1 }
 0x15c   :  { %v411_v39 = vadd.f32 %v1095_v34, %v410_v37  ;;  %v777_v40 = vpop.f32.mrb[33].mxu0  ;;  %v515_v41 = vadd.f32 %v1095_v34, %v514_v38  ;;  %v829_v42 = vpop.f32.mrb[33].mxu1 }
 0x15d   :  { %v413_v43 = vpop.f32.mrb[34].mxu0  ;;  %v517_v44 = vpop.f32.mrb[34].mxu1 }
 0x15e   :  { %v560_v45 = vmax.f32 %v411_v39, 0.0  ;;  %v414_v46 = vadd.f32 %v1095_v34, %v413_v43  ;;  %v778_v47 = vpop.f32.mrb[35].mxu0  ;;  %v586_v48 = vmax.f32 %v515_v41, 0.0  ;;  %v518_v49 = vadd.f32 %v1095_v34, %v517_v44  ;;  %v830_v50 = vpop.f32.mrb[35].mxu1 }
 0x160   :  { %609 = vst [vmem:[#allocation7 + $0x80] sm:$0xff] %v560_v45  ;;  %v561_v51 = vmax.f32 %v414_v46, 0.0  ;;  %635 = vst [vmem:[#allocation7 + $0x150] sm:$0xff] %v586_v48  ;;  %v587_v52 = vmax.f32 %v518_v49, 0.0 }
 0x162   :  { %610 = vst [vmem:[#allocation7 + $0x88] sm:$0xff] %v561_v51  ;;  %636 = vst [vmem:[#allocation7 + $0x158] sm:$0xff] %v587_v52 }
 0x163   :  { %v418_v53 = vpop.f32.mrb[36].mxu0  ;;  %v522_v54 = vpop.f32.mrb[36].mxu1 }
 0x164   :  { %v419_v55 = vadd.f32 %v1095_v34, %v418_v53  ;;  %v781_v56 = vpop.f32.mrb[37].mxu0  ;;  %v523_v57 = vadd.f32 %v1095_v34, %v522_v54  ;;  %v833_v58 = vpop.f32.mrb[37].mxu1 }
 0x165   :  { %v421_v59 = vpop.f32.mrb[38].mxu0  ;;  %v525_v60 = vpop.f32.mrb[38].mxu1 }
 0x166   :  { %v562_v61 = vmax.f32 %v419_v55, 0.0  ;;  %v422_v62 = vadd.f32 %v1095_v34, %v421_v59  ;;  %v782_v63 = vpop.f32.mrb[39].mxu0  ;;  %v588_v0 = vmax.f32 %v523_v57, 0.0  ;;  %v526_v1 = vadd.f32 %v1095_v34, %v525_v60  ;;  %v834_v2 = vpop.f32.mrb[39].mxu1 }
 0x168   :  { %611 = vst [vmem:[#allocation7 + $0x90] sm:$0xff] %v562_v61  ;;  %v563_v3 = vmax.f32 %v422_v62, 0.0  ;;  %637 = vst [vmem:[#allocation7 + $0x160] sm:$0xff] %v588_v0  ;;  %v589_v4 = vmax.f32 %v526_v1, 0.0 }
 0x16a   :  { %612 = vst [vmem:[#allocation7 + $0x98] sm:$0xff] %v563_v3  ;;  %638 = vst [vmem:[#allocation7 + $0x168] sm:$0xff] %v589_v4 }
 0x16b   :  { %v426_v5 = vpop.f32.mrb[40].mxu0  ;;  %v530_v6 = vpop.f32.mrb[40].mxu1 }
 0x16c   :  { %v427_v7 = vadd.f32 %v1095_v34, %v426_v5  ;;  %v785_v8 = vpop.f32.mrb[41].mxu0  ;;  %v531_v9 = vadd.f32 %v1095_v34, %v530_v6  ;;  %v837_v10 = vpop.f32.mrb[41].mxu1 }
 0x16d   :  { %v429_v11 = vpop.f32.mrb[42].mxu0  ;;  %v533_v12 = vpop.f32.mrb[42].mxu1 }
 0x16e   :  { %v564_v13 = vmax.f32 %v427_v7, 0.0  ;;  %v430_v14 = vadd.f32 %v1095_v34, %v429_v11  ;;  %v786_v15 = vpop.f32.mrb[43].mxu0  ;;  %v590_v16 = vmax.f32 %v531_v9, 0.0  ;;  %v534_v17 = vadd.f32 %v1095_v34, %v533_v12  ;;  %v838_v18 = vpop.f32.mrb[43].mxu1 }
 0x170   :  { %613 = vst [vmem:[#allocation7 + $0xa0] sm:$0xff] %v564_v13  ;;  %v565_v19 = vmax.f32 %v430_v14, 0.0  ;;  %639 = vst [vmem:[#allocation7 + $0x170] sm:$0xff] %v590_v16  ;;  %v591_v20 = vmax.f32 %v534_v17, 0.0 }
 0x172   :  { %614 = vst [vmem:[#allocation7 + $0xa8] sm:$0xff] %v565_v19  ;;  %640 = vst [vmem:[#allocation7 + $0x178] sm:$0xff] %v591_v20 }
 0x173   :  { %v434_v21 = vpop.f32.mrb[44].mxu0  ;;  %v538_v22 = vpop.f32.mrb[44].mxu1 }
 0x174   :  { %v435_v23 = vadd.f32 %v1095_v34, %v434_v21  ;;  %v789_v24 = vpop.f32.mrb[45].mxu0  ;;  %v539_v25 = vadd.f32 %v1095_v34, %v538_v22  ;;  %v841_v26 = vpop.f32.mrb[45].mxu1 }
 0x175   :  { %v437_v27 = vpop.f32.mrb[46].mxu0  ;;  %v541_v28 = vpop.f32.mrb[46].mxu1 }
 0x176   :  { %v566_v29 = vmax.f32 %v435_v23, 0.0  ;;  %v438_v30 = vadd.f32 %v1095_v34, %v437_v27  ;;  %v790_v31 = vpop.f32.mrb[47].mxu0  ;;  %v592_v32 = vmax.f32 %v539_v25, 0.0  ;;  %v842_v33 = vpop.f32.mrb[47].mxu1 }
 0x178   :  { %615 = vst [vmem:[#allocation7 + $0xb0] sm:$0xff] %v566_v29  ;;  %v567_v35 = vmax.f32 %v438_v30, 0.0  ;;  %641 = vst [vmem:[#allocation7 + $0x180] sm:$0xff] %v592_v32 }
 0x17a   :  { %616 = vst [vmem:[#allocation7 + $0xb8] sm:$0xff] %v567_v35 }
 0x17b   :  { %v442_v36 = vpop.f32.mrb[48].mxu0 }
 0x17c   :  { %v443_v37 = vadd.f32 %v1095_v34, %v442_v36  ;;  %v793_v38 = vpop.f32.mrb[49].mxu0 }
 0x17d   :  { %v445_v39 = vpop.f32.mrb[50].mxu0 }
 0x17e   :  { %v568_v40 = vmax.f32 %v443_v37, 0.0  ;;  %v446_v41 = vadd.f32 %v1095_v34, %v445_v39  ;;  %v794_v42 = vpop.f32.mrb[51].mxu0 }
 0x180   :  { %617 = vst [vmem:[#allocation7 + $0xc0] sm:$0xff] %v568_v40  ;;  %v569_v43 = vmax.f32 %v446_v41, 0.0 }
 0x182   :  { %618 = vst [vmem:[#allocation7 + $0xc8] sm:$0xff] %v569_v43 }
 0x183   :  { %956 = shalt.err (!%p953_p6)
}
 0x184   :  { %s957_s15 = scalar_lea.hbm %s1161_s3, 6272 }
 0x185   :  { %p958_p7 = scmp.ne.s32.totalorder %s1161_s3, %s957_s15  ;;  %p961_p8 = scmp.lt.u32.totalorder %s957_s15, %s1161_s3 }
 0x187   :  { %p963_p9 = pnand %p961_p8, %p958_p7 }
 0x189   :  { %966 = shalt.err (!%p963_p9)
}
 0x18a   :  { %s980_s20 = smov 128   ;;  %s981_s21 = smov 8  }
 0x18b   :  { %653 = dma.vmem_to_hbm [thread:$0]  %s648_s11, 6272, %s1161_s3, [#allocation4], %s980_s20, %s980_s20, %s981_s21  }
 0x18c   :  { %971 = dma.done.wait [#allocation4], 6272  }
 0x18d   :  { %972 = vsyncadd [#allocation4], 4294961024 }
 0x18e   :  { %657 = vsyncpa [#allocation3], 1 }
 0x18f   :  { %658 = vsyncpa [#allocation6], 1 }
 0x190   :  { %659 = vsyncpa [#allocation4], 1 }

</bundles_post_ra>
